<compile_context>
chip_gen: v6e
topology: v6e:2x2x1
jax: 0.10.0
libtpu: 0.0.40
codegen_flags: <defaults>
</compile_context>

<pallas_src>
import functools

import jax
import jax.numpy as jnp
from jax import lax
from jax.experimental import pallas as pl
from jax.experimental.pallas import tpu as pltpu


def _round_up(v, m):
    return (v + m - 1) // m * m


def cluster_softmax_kernel(xy_ref, label_ref, w12_ref, b1_ref, l2w_ref, l2b_ref,
                           out_ref, *, m, s, d_pad):
    TB = xy_ref.shape[0]
    C = l2w_ref.shape[1]

    # --- per-row L2 normalization of the two embedding halves (x | y) ----------
    # rsqrt(max(sum_sq, 1e-24)) == x / clamp(||x||, 1e-12)   (EUP instead of VALU divides)
    xy = xy_ref[...].astype(jnp.float32)
    lane = lax.broadcasted_iota(jnp.int32, xy.shape, 1)
    is_x = lane < d_pad
    sq = xy * xy
    ssx = jnp.sum(jnp.where(is_x, sq, 0.0), axis=1, keepdims=True)
    ssy = jnp.sum(jnp.where(is_x, 0.0, sq), axis=1, keepdims=True)
    inv_x = lax.rsqrt(jnp.maximum(ssx, 1e-24))
    inv_y = lax.rsqrt(jnp.maximum(ssy, 1e-24))
    xyn = xy * jnp.where(is_x, inv_x, inv_y)

    # --- fused first layer: single (TB, 2Dp) @ (2Dp, Dh_p) MXU pass -------------
    # w12_ref holds [w1_eff ; w2_eff] (already folded with L1 weight + BN affine).
    h = jnp.dot(xyn.astype(w12_ref.dtype), w12_ref[...],
                preferred_element_type=jnp.float32) + b1_ref[...]
    h = jnp.maximum(h, 0.0)                      # ReLU; Dropout = identity (eval)

    logits = jnp.dot(h.astype(l2w_ref.dtype), l2w_ref[...],
                     preferred_element_type=jnp.float32) + l2b_ref[...]

    label = label_ref[...]                       # (TB, 1) int32; -1 marks pad rows
    cls = lax.broadcasted_iota(jnp.int32, (TB, C), 1)
    onehot = (cls == label).astype(jnp.float32)  # all-zero for pad rows
    outputs = s * logits - (s * m) * onehot      # margin at the target class, scaled

    # cross-entropy partial sum (pad rows contribute exactly 0 via `valid`)
    mx = jnp.max(outputs, axis=1, keepdims=True)
    sh = outputs - mx
    lse = jnp.log(jnp.sum(jnp.exp(sh), axis=1, keepdims=True))
    valid = (label >= 0).astype(jnp.float32)
    tgt_logp = jnp.sum(sh * onehot, axis=1, keepdims=True) - lse * valid
    loss_sum = -jnp.sum(tgt_logp, axis=0, keepdims=True)                 # (1, 1)

    # argmax (first max index) + correct count; pad rows (label=-1) never match,
    # padded classes carry a -1e9 bias so they never become the max.
    pred = jnp.min(jnp.where(outputs == mx, cls, C), axis=1, keepdims=True)
    correct = jnp.sum((pred == label).astype(jnp.float32), axis=0, keepdims=True)

    # (8, 128)-aligned partial tile: [0,0]=loss_sum, [0,1]=correct, rest zeros
    row = lax.broadcasted_iota(jnp.int32, (8, 128), 0)
    col = lax.broadcasted_iota(jnp.int32, (8, 128), 1)
    out_ref[...] = jnp.where((row == 0) & (col == 0), loss_sum,
                             jnp.where((row == 0) & (col == 1), correct, 0.0))


def init_params(key, input_dim, target_dim):
    D = input_dim
    Dh = D // 2
    k = jax.random.split(key, 4)
    # W1, W2 ~ normal(0, 1), shape (D//2, D)
    W1 = jax.random.normal(k[0], (Dh, D), jnp.float32)
    W2 = jax.random.normal(k[1], (Dh, D), jnp.float32)
    # nn.Linear with kaiming_normal_: std = sqrt(2 / fan_in); bias = 0.01
    l1_w = jax.random.normal(k[2], (Dh, D), jnp.float32) * jnp.sqrt(2.0 / D)
    l2_w = jax.random.normal(k[3], (target_dim, Dh), jnp.float32) * jnp.sqrt(2.0 / Dh)
    return dict(
        W1=W1, W2=W2,
        l1_w=l1_w, l1_b=jnp.full((Dh,), 0.01, jnp.float32),
        l2_w=l2_w, l2_b=jnp.full((target_dim,), 0.01, jnp.float32),
        bn_gamma=jnp.ones((Dh,), jnp.float32), bn_beta=jnp.zeros((Dh,), jnp.float32),
        bn_mean=jnp.zeros((Dh,), jnp.float32), bn_var=jnp.ones((Dh,), jnp.float32),
    )


def cluster_softmax_loss(x_embed, y_embed, label, params, *, m=0.35, s=30.0,
                         block_b=512, matmul_dtype=jnp.bfloat16):
    B, D = x_embed.shape
    Dh = D // 2
    C = params["l2_b"].shape[0]
    f32 = jnp.float32

    # ---- batch-independent weight math, hoisted out of the kernel --------------
    eps = 1e-3
    w1n = params["W1"] / jnp.maximum(
        jnp.linalg.norm(params["W1"], axis=0, keepdims=True), 1e-12)      # (Dh, D)
    w2n = params["W2"] / jnp.maximum(
        jnp.linalg.norm(params["W2"], axis=0, keepdims=True), 1e-12)      # (Dh, D)
    l1w_t = params["l1_w"].T                                              # (D, Dh)
    bn_scale = params["bn_gamma"] / jnp.sqrt(params["bn_var"] + eps)      # (Dh,)
    bn_shift = params["bn_beta"] - params["bn_mean"] * bn_scale           # (Dh,)
    # fold: BN(relu-input) of  concat(xn@w1n.T, yn@w2n.T) @ L1.T + b1
    w1_eff = (w1n.T @ l1w_t[:Dh, :]) * bn_scale                           # (D, Dh)
    w2_eff = (w2n.T @ l1w_t[Dh:, :]) * bn_scale                           # (D, Dh)
    b1_eff = params["l1_b"] * bn_scale + bn_shift                         # (Dh,)
    l2w_t = params["l2_w"].T                                              # (Dh, C)

    # ---- lane-dense padding (each embedding half, hidden dim, class dim -> x128)
    Dp = _round_up(D, 128)
    Dh_p = _round_up(Dh, 128)
    C_p = _round_up(C, 128)

    w12 = jnp.zeros((2 * Dp, Dh_p), f32)
    w12 = w12.at[:D, :Dh].set(w1_eff).at[Dp:Dp + D, :Dh].set(w2_eff)
    b1 = jnp.zeros((1, Dh_p), f32).at[0, :Dh].set(b1_eff)
    l2w = jnp.zeros((Dh_p, C_p), f32).at[:Dh, :C].set(l2w_t)
    # padded classes get a very negative bias so they never win softmax/argmax
    l2b = jnp.full((1, C_p), -1e9, f32).at[0, :C].set(params["l2_b"])
    w12 = w12.astype(matmul_dtype)            # bf16 MXU operands (f32 accumulate)
    l2w = l2w.astype(matmul_dtype)

    # ---- batch tiling: large tiles, >=2 chunks when B allows (v7x megacore),
    #      bounded by the (TB, C_p) softmax working set ---------------------------
    block_b = max(8, (block_b // 8) * 8)
    TB = min(block_b, _round_up(max(pl.cdiv(B, 2), 8), 8))
    tb_cap = max(64, ((2 << 20) // (4 * C_p)) // 8 * 8)      # bound (TB,C_p) temps
    TB = max(8, min(TB, tb_cap))
    B_pad = _round_up(B, TB)
    num_chunks = B_pad // TB

    label = label.astype(jnp.int32)
    xy = jnp.zeros((B_pad, 2 * Dp), f32)
    xy = xy.at[:B, :D].set(x_embed).at[:B, Dp:Dp + D].set(y_embed)
    xy = xy.astype(matmul_dtype)
    label2d = jnp.full((B_pad, 1), -1, jnp.int32).at[:B, 0].set(label)

    kernel = functools.partial(cluster_softmax_kernel, m=float(m), s=float(s),
                               d_pad=Dp)

    # ---- generation-aware VMEM budget + cost hints -------------------------------
    try:
        phys_vmem = int(pltpu.get_tpu_info().vmem_capacity_bytes)
    except Exception:
        phys_vmem = 128 << 20
    vmem_cap = (phys_vmem * 3) // 4          # ~48 MiB on v7x, ~96 MiB on v5e/v6e
    wsize = jnp.dtype(matmul_dtype).itemsize
    weight_bytes = wsize * (2 * Dp * Dh_p + Dh_p * C_p) + 4 * (Dh_p + C_p)
    act_bytes = wsize * TB * 2 * Dp + 4 * TB + 4 * 8 * 128
    vmem_limit = int(min(max(weight_bytes + 6 * act_bytes + (8 << 20), 32 << 20),
                         vmem_cap))

    flops = int(B_pad * (4 * Dp * Dh_p + 2 * Dh_p * C_p + 8 * Dp + 10 * C_p))
    transcendentals = int(B_pad * (C_p + 3))
    bytes_accessed = int(B_pad * (wsize * 2 * Dp + 4)
                         + weight_bytes + 4 * num_chunks * 8 * 128)
    cost = pl.CostEstimate(flops=flops, transcendentals=transcendentals,
                           bytes_accessed=bytes_accessed)

    def _build_and_call(use_pipeline_mode):
        def spec(shape, index_map, mode):
            if use_pipeline_mode and mode is not None:
                return pl.BlockSpec(shape, index_map, pipeline_mode=mode)
            return pl.BlockSpec(shape, index_map)

        # Single-buffer the VMEM-resident weights; 3-deep activation buffering only
        # where VMEM is plentiful (v5e/v6e 128 MiB) and the grid is long enough.
        resident = pl.Buffered(1) if use_pipeline_mode else None
        act_mode = (pl.Buffered(3)
                    if (use_pipeline_mode and phys_vmem >= (100 << 20)
                        and num_chunks >= 3) else None)

        return pl.pallas_call(
            kernel,
            out_shape=jax.ShapeDtypeStruct((num_chunks * 8, 128), f32),
            grid_spec=pltpu.PrefetchScalarGridSpec(
                num_scalar_prefetch=0,
                grid=(num_chunks,),
                in_specs=[
                    spec((TB, 2 * Dp), lambda i: (i, 0), act_mode),    # x|y chunk
                    spec((TB, 1), lambda i: (i, 0), None),             # labels chunk
                    spec((2 * Dp, Dh_p), lambda i: (0, 0), resident),  # fused L1 weight
                    spec((1, Dh_p), lambda i: (0, 0), resident),       # fused L1 bias
                    spec((Dh_p, C_p), lambda i: (0, 0), resident),     # L2 weight
                    spec((1, C_p), lambda i: (0, 0), resident),        # L2 bias
                ],
                out_specs=pl.BlockSpec((8, 128), lambda i: (i, 0)),
            ),
            compiler_params=pltpu.CompilerParams(
                dimension_semantics=("parallel",),
                vmem_limit_bytes=vmem_limit),
            cost_estimate=cost,
        )(xy, label2d, w12, b1, l2w, l2b)

    try:
        partials = _build_and_call(True)
    except Exception:
        # pipeline_mode / pl.Buffered not available in this jax build -> defaults
        partials = _build_and_call(False)

    totals = jnp.sum(partials.reshape(num_chunks, 8, 128)[:, 0, :2], axis=0)
    loss = totals[0] / B
    acc = totals[1] / B
    return loss, acc


def reference_loss(x_embed, y_embed, label, params, *, m=0.35, s=30.0):
    # Pure-JAX f32 reference with identical (eval-mode) semantics to the torch module.
    D = x_embed.shape[1]
    Dh = D // 2
    C = params["l2_b"].shape[0]
    eps = 1e-3
    w1n = params["W1"] / jnp.maximum(
        jnp.linalg.norm(params["W1"], axis=0, keepdims=True), 1e-12)
    w2n = params["W2"] / jnp.maximum(
        jnp.linalg.norm(params["W2"], axis=0, keepdims=True), 1e-12)
    xn = x_embed / jnp.maximum(jnp.linalg.norm(x_embed, axis=1, keepdims=True), 1e-12)
    yn = y_embed / jnp.maximum(jnp.linalg.norm(y_embed, axis=1, keepdims=True), 1e-12)
    costh = jnp.concatenate([xn @ w1n.T, yn @ w2n.T], axis=1)
    h = costh @ params["l1_w"].T + params["l1_b"]
    h = (h - params["bn_mean"]) / jnp.sqrt(params["bn_var"] + eps) \
        * params["bn_gamma"] + params["bn_beta"]
    h = jnp.maximum(h, 0.0)
    logits = h @ params["l2_w"].T + params["l2_b"]
    onehot = jax.nn.one_hot(label, C, dtype=jnp.float32)
    outputs = s * (logits - m * onehot)
    logp = jax.nn.log_softmax(outputs, axis=1)
    loss = -jnp.mean(jnp.sum(logp * onehot, axis=1))
    acc = jnp.mean((jnp.argmax(outputs, axis=1) == label).astype(jnp.float32))
    return loss, acc


if __name__ == "__main__":
    B = 8
    INPUT_DIM = 64     # hidden D//2 = 32 -> padded to 128 lanes in the kernel
    TARGET_DIM = 16    # padded to 128 classes (masked with -1e9 bias) in the kernel

    key = jax.random.PRNGKey(0)
    kp, kx, ky, kl = jax.random.split(key, 4)
    params = init_params(kp, INPUT_DIM, TARGET_DIM)
    x_embed = jax.random.normal(kx, (B, INPUT_DIM), jnp.float32)
    y_embed = jax.random.normal(ky, (B, INPUT_DIM), jnp.float32)
    label = jax.random.randint(kl, (B,), 0, TARGET_DIM, dtype=jnp.int32)

    ref_loss, ref_acc = reference_loss(x_embed, y_embed, label, params)

    # 1) f32 MXU-operand path: tight numerical check against the pure-JAX reference.
    loss32, acc32 = cluster_softmax_loss(x_embed, y_embed, label, params,
                                         matmul_dtype=jnp.float32)
    jax.block_until_ready((loss32, acc32))
    assert jnp.allclose(loss32, ref_loss, atol=1e-3, rtol=1e-3), (loss32, ref_loss)
    assert jnp.allclose(acc32, ref_acc, atol=1e-6), (acc32, ref_acc)

    # 2) default bf16 MXU-operand path: looser tolerance (bf16 operand rounding);
    #    accuracy may differ by at most one sample in a tiny batch near logit ties.
    loss_bf, acc_bf = cluster_softmax_loss(x_embed, y_embed, label, params)
    jax.block_until_ready((loss_bf, acc_bf))
    assert jnp.allclose(loss_bf, ref_loss, atol=5e-2, rtol=5e-2), (loss_bf, ref_loss)
    assert abs(float(acc_bf) - float(ref_acc)) <= 1.0 / B + 1e-6, (acc_bf, ref_acc)

    print("KERNEL_OK")
</pallas_src>

<mosaic_0001>
module attributes {stable_mosaic.version = 11 : i64} {
  func.func @cluster_softmax_kernel(%arg0: i32, %arg1: memref<8x256xf32, #tpu.memory_space<vmem>>, %arg2: memref<8x1xi32, #tpu.memory_space<vmem>>, %arg3: memref<256x128xf32, #tpu.memory_space<vmem>>, %arg4: memref<1x128xf32, #tpu.memory_space<vmem>>, %arg5: memref<128x128xf32, #tpu.memory_space<vmem>>, %arg6: memref<1x128xf32, #tpu.memory_space<vmem>>, %arg7: memref<8x128xf32, #tpu.memory_space<vmem>>) attributes {dimension_semantics = [#tpu.dimension_semantics<parallel>], iteration_bounds = array<i64: 1>, scalar_prefetch = 0 : i64, scratch_operands = 0 : i64, tpu.core_type = #tpu.core_type<tc>, window_params = [{transform_indices = @transform_0, window_bounds = array<i64: 8, 256>}, {transform_indices = @transform_1, window_bounds = array<i64: 8, 1>}, {pipeline_mode = #tpu.pipeline_mode<synchronous>, transform_indices = @transform_2, window_bounds = array<i64: 256, 128>}, {pipeline_mode = #tpu.pipeline_mode<synchronous>, transform_indices = @transform_3, window_bounds = array<i64: 1, 128>}, {pipeline_mode = #tpu.pipeline_mode<synchronous>, transform_indices = @transform_4, window_bounds = array<i64: 128, 128>}, {pipeline_mode = #tpu.pipeline_mode<synchronous>, transform_indices = @transform_5, window_bounds = array<i64: 1, 128>}, {transform_indices = @transform_6, window_bounds = array<i64: 8, 128>}]} {
    %c0 = arith.constant 0 : index
    %c0_0 = arith.constant 0 : index
    %0 = vector.load %arg1[%c0, %c0_0] : memref<8x256xf32, #tpu.memory_space<vmem>>, vector<8x256xf32>
    %1 = tpu.iota {dimensions = array<i32: 1>} : vector<8x256xi32>
    %c128_i32 = arith.constant 128 : i32
    %2 = vector.broadcast %c128_i32 : i32 to vector<8x256xi32>
    %3 = arith.cmpi slt, %1, %2 : vector<8x256xi32>
    %4 = arith.mulf %0, %0 : vector<8x256xf32>
    %cst = arith.constant 0.000000e+00 : f32
    %5 = vector.broadcast %cst : f32 to vector<8x256xf32>
    %6 = arith.select %3, %4, %5 : vector<8x256xi1>, vector<8x256xf32>
    %cst_1 = arith.constant dense<0.000000e+00> : vector<8xf32>
    %7 = vector.multi_reduction <add>, %6, %cst_1 [1] : vector<8x256xf32> to vector<8xf32>
    %8 = vector.shape_cast %7 : vector<8xf32> to vector<8x1xf32>
    %cst_2 = arith.constant 0.000000e+00 : f32
    %9 = vector.broadcast %cst_2 : f32 to vector<8x256xf32>
    %10 = arith.select %3, %9, %4 : vector<8x256xi1>, vector<8x256xf32>
    %cst_3 = arith.constant dense<0.000000e+00> : vector<8xf32>
    %11 = vector.multi_reduction <add>, %10, %cst_3 [1] : vector<8x256xf32> to vector<8xf32>
    %12 = vector.shape_cast %11 : vector<8xf32> to vector<8x1xf32>
    %cst_4 = arith.constant 1.000000e-24 : f32
    %13 = vector.broadcast %cst_4 : f32 to vector<8x1xf32>
    %14 = arith.maximumf %8, %13 : vector<8x1xf32>
    %15 = math.rsqrt %14 : vector<8x1xf32>
    %cst_5 = arith.constant 1.000000e-24 : f32
    %16 = vector.broadcast %cst_5 : f32 to vector<8x1xf32>
    %17 = arith.maximumf %12, %16 : vector<8x1xf32>
    %18 = math.rsqrt %17 : vector<8x1xf32>
    %19 = vector.shape_cast %15 : vector<8x1xf32> to vector<8x1xf32>
    %20 = vector.broadcast %19 : vector<8x1xf32> to vector<8x256xf32>
    %21 = vector.shape_cast %18 : vector<8x1xf32> to vector<8x1xf32>
    %22 = vector.broadcast %21 : vector<8x1xf32> to vector<8x256xf32>
    %23 = arith.select %3, %20, %22 : vector<8x256xi1>, vector<8x256xf32>
    %24 = arith.mulf %0, %23 : vector<8x256xf32>
    %c0_6 = arith.constant 0 : index
    %c0_7 = arith.constant 0 : index
    %25 = vector.load %arg3[%c0_6, %c0_7] : memref<256x128xf32, #tpu.memory_space<vmem>>, vector<256x128xf32>
    %cst_8 = arith.constant dense<0.000000e+00> : vector<8x128xf32>
    %26 = tpu.matmul %24, %25, %cst_8 {dimension_numbers = #tpu.dot_dimension_numbers<[1], [0], [0], [1], [0, 0, 1, 1], [], []>} : vector<8x256xf32>, vector<256x128xf32>, vector<8x128xf32> -> vector<8x128xf32>
    %c0_9 = arith.constant 0 : index
    %c0_10 = arith.constant 0 : index
    %27 = vector.load %arg4[%c0_9, %c0_10] : memref<1x128xf32, #tpu.memory_space<vmem>>, vector<1x128xf32>
    %28 = vector.broadcast %27 : vector<1x128xf32> to vector<8x128xf32>
    %29 = arith.addf %26, %28 : vector<8x128xf32>
    %cst_11 = arith.constant 0.000000e+00 : f32
    %30 = vector.broadcast %cst_11 : f32 to vector<8x128xf32>
    %31 = arith.maximumf %29, %30 : vector<8x128xf32>
    %c0_12 = arith.constant 0 : index
    %c0_13 = arith.constant 0 : index
    %32 = vector.load %arg5[%c0_12, %c0_13] : memref<128x128xf32, #tpu.memory_space<vmem>>, vector<128x128xf32>
    %cst_14 = arith.constant dense<0.000000e+00> : vector<8x128xf32>
    %33 = tpu.matmul %31, %32, %cst_14 {dimension_numbers = #tpu.dot_dimension_numbers<[1], [0], [0], [1], [0, 0, 1, 1], [], []>} : vector<8x128xf32>, vector<128x128xf32>, vector<8x128xf32> -> vector<8x128xf32>
    %c0_15 = arith.constant 0 : index
    %c0_16 = arith.constant 0 : index
    %34 = vector.load %arg6[%c0_15, %c0_16] : memref<1x128xf32, #tpu.memory_space<vmem>>, vector<1x128xf32>
    %35 = vector.broadcast %34 : vector<1x128xf32> to vector<8x128xf32>
    %36 = arith.addf %33, %35 : vector<8x128xf32>
    %c0_17 = arith.constant 0 : index
    %c0_18 = arith.constant 0 : index
    %37 = vector.load %arg2[%c0_17, %c0_18] : memref<8x1xi32, #tpu.memory_space<vmem>>, vector<8x1xi32>
    %38 = tpu.iota {dimensions = array<i32: 1>} : vector<8x128xi32>
    %39 = vector.broadcast %37 : vector<8x1xi32> to vector<8x128xi32>
    %40 = arith.cmpi eq, %38, %39 : vector<8x128xi32>
    %41 = arith.extui %40 : vector<8x128xi1> to vector<8x128xi32>
    %42 = arith.sitofp %41 : vector<8x128xi32> to vector<8x128xf32>
    %cst_19 = arith.constant 3.000000e+01 : f32
    %43 = vector.broadcast %cst_19 : f32 to vector<8x128xf32>
    %44 = arith.mulf %43, %36 : vector<8x128xf32>
    %cst_20 = arith.constant 1.050000e+01 : f32
    %45 = vector.broadcast %cst_20 : f32 to vector<8x128xf32>
    %46 = arith.mulf %45, %42 : vector<8x128xf32>
    %47 = arith.subf %44, %46 : vector<8x128xf32>
    %cst_21 = arith.constant dense<0xFF800000> : vector<8xf32>
    %48 = vector.multi_reduction <maximumf>, %47, %cst_21 [1] : vector<8x128xf32> to vector<8xf32>
    %49 = vector.shape_cast %48 : vector<8xf32> to vector<8x1xf32>
    %50 = vector.broadcast %49 : vector<8x1xf32> to vector<8x128xf32>
    %51 = arith.subf %47, %50 : vector<8x128xf32>
    %52 = math.exp %51 : vector<8x128xf32>
    %cst_22 = arith.constant dense<0.000000e+00> : vector<8xf32>
    %53 = vector.multi_reduction <add>, %52, %cst_22 [1] : vector<8x128xf32> to vector<8xf32>
    %54 = vector.shape_cast %53 : vector<8xf32> to vector<8x1xf32>
    %55 = math.log %54 : vector<8x1xf32>
    %c0_i32 = arith.constant 0 : i32
    %56 = vector.broadcast %c0_i32 : i32 to vector<8x1xi32>
    %57 = arith.cmpi sge, %37, %56 : vector<8x1xi32>
    %58 = arith.extui %57 : vector<8x1xi1> to vector<8x1xi32>
    %59 = arith.sitofp %58 : vector<8x1xi32> to vector<8x1xf32>
    %60 = arith.mulf %51, %42 : vector<8x128xf32>
    %cst_23 = arith.constant dense<0.000000e+00> : vector<8xf32>
    %61 = vector.multi_reduction <add>, %60, %cst_23 [1] : vector<8x128xf32> to vector<8xf32>
    %62 = vector.shape_cast %61 : vector<8xf32> to vector<8x1xf32>
    %63 = arith.mulf %55, %59 : vector<8x1xf32>
    %64 = arith.subf %62, %63 : vector<8x1xf32>
    %cst_24 = arith.constant dense<0.000000e+00> : vector<1xf32>
    %65 = vector.multi_reduction <add>, %64, %cst_24 [0] : vector<8x1xf32> to vector<1xf32>
    %66 = vector.shape_cast %65 : vector<1xf32> to vector<1x1xf32>
    %cst_25 = arith.constant 0.000000e+00 : f32
    %67 = vector.broadcast %cst_25 : f32 to vector<1x1xf32>
    %68 = arith.subf %67, %66 : vector<1x1xf32>
    %69 = vector.broadcast %49 : vector<8x1xf32> to vector<8x128xf32>
    %70 = arith.cmpf oeq, %47, %69 : vector<8x128xf32>
    %c128_i32_26 = arith.constant 128 : i32
    %71 = vector.broadcast %c128_i32_26 : i32 to vector<8x128xi32>
    %72 = arith.select %70, %38, %71 : vector<8x128xi1>, vector<8x128xi32>
    %cst_27 = arith.constant dense<2147483647> : vector<8xi32>
    %73 = vector.multi_reduction <minsi>, %72, %cst_27 [1] : vector<8x128xi32> to vector<8xi32>
    %74 = vector.shape_cast %73 : vector<8xi32> to vector<8x1xi32>
    %75 = arith.cmpi eq, %74, %37 : vector<8x1xi32>
    %76 = arith.extui %75 : vector<8x1xi1> to vector<8x1xi32>
    %77 = arith.sitofp %76 : vector<8x1xi32> to vector<8x1xf32>
    %cst_28 = arith.constant dense<0.000000e+00> : vector<1xf32>
    %78 = vector.multi_reduction <add>, %77, %cst_28 [0] : vector<8x1xf32> to vector<1xf32>
    %79 = vector.shape_cast %78 : vector<1xf32> to vector<1x1xf32>
    %80 = tpu.iota {dimensions = array<i32: 0>} : vector<8x128xi32>
    %81 = tpu.iota {dimensions = array<i32: 1>} : vector<8x128xi32>
    %c0_i32_29 = arith.constant 0 : i32
    %82 = vector.broadcast %c0_i32_29 : i32 to vector<8x128xi32>
    %83 = arith.cmpi eq, %80, %82 : vector<8x128xi32>
    %c0_i32_30 = arith.constant 0 : i32
    %84 = vector.broadcast %c0_i32_30 : i32 to vector<8x128xi32>
    %85 = arith.cmpi eq, %81, %84 : vector<8x128xi32>
    %86 = arith.andi %83, %85 : vector<8x128xi1>
    %c0_i32_31 = arith.constant 0 : i32
    %87 = vector.broadcast %c0_i32_31 : i32 to vector<8x128xi32>
    %88 = arith.cmpi eq, %80, %87 : vector<8x128xi32>
    %c1_i32 = arith.constant 1 : i32
    %89 = vector.broadcast %c1_i32 : i32 to vector<8x128xi32>
    %90 = arith.cmpi eq, %81, %89 : vector<8x128xi32>
    %91 = arith.andi %88, %90 : vector<8x128xi1>
    %cst_32 = arith.constant 0.000000e+00 : f32
    %92 = vector.shape_cast %79 : vector<1x1xf32> to vector<1x1xf32>
    %93 = vector.broadcast %92 : vector<1x1xf32> to vector<8x128xf32>
    %94 = vector.broadcast %cst_32 : f32 to vector<8x128xf32>
    %95 = arith.select %91, %93, %94 : vector<8x128xi1>, vector<8x128xf32>
    %96 = vector.shape_cast %68 : vector<1x1xf32> to vector<1x1xf32>
    %97 = vector.broadcast %96 : vector<1x1xf32> to vector<8x128xf32>
    %98 = arith.select %86, %97, %95 : vector<8x128xi1>, vector<8x128xf32>
    %c0_33 = arith.constant 0 : index
    %c0_34 = arith.constant 0 : index
    %99 = vector.load %arg7[%c0_33, %c0_34] : memref<8x128xf32, #tpu.memory_space<vmem>>, vector<8x128xf32>
    tpu.vector_store %arg7[%c0_33, %c0_34], %98 {strides = array<i32>} : memref<8x128xf32, #tpu.memory_space<vmem>>, vector<8x128xf32>,
    return
  }
  func.func @transform_0(%arg0: i32) -> (i32, i32) {
    %c0_i32 = arith.constant 0 : i32
    %c0_i32_0 = arith.constant 0 : i32
    return %arg0, %c0_i32 : i32, i32
  }
  func.func @transform_1(%arg0: i32) -> (i32, i32) {
    %c0_i32 = arith.constant 0 : i32
    %c0_i32_0 = arith.constant 0 : i32
    return %arg0, %c0_i32 : i32, i32
  }
  func.func @transform_2(%arg0: i32) -> (i32, i32) {
    %c0_i32 = arith.constant 0 : i32
    %c0_i32_0 = arith.constant 0 : i32
    %c0_i32_1 = arith.constant 0 : i32
    return %c0_i32, %c0_i32_0 : i32, i32
  }
  func.func @transform_3(%arg0: i32) -> (i32, i32) {
    %c0_i32 = arith.constant 0 : i32
    %c0_i32_0 = arith.constant 0 : i32
    %c0_i32_1 = arith.constant 0 : i32
    return %c0_i32, %c0_i32_0 : i32, i32
  }
  func.func @transform_4(%arg0: i32) -> (i32, i32) {
    %c0_i32 = arith.constant 0 : i32
    %c0_i32_0 = arith.constant 0 : i32
    %c0_i32_1 = arith.constant 0 : i32
    return %c0_i32, %c0_i32_0 : i32, i32
  }
  func.func @transform_5(%arg0: i32) -> (i32, i32) {
    %c0_i32 = arith.constant 0 : i32
    %c0_i32_0 = arith.constant 0 : i32
    %c0_i32_1 = arith.constant 0 : i32
    return %c0_i32, %c0_i32_0 : i32, i32
  }
  func.func @transform_6(%arg0: i32) -> (i32, i32) {
    %c0_i32 = arith.constant 0 : i32
    %c0_i32_0 = arith.constant 0 : i32
    return %arg0, %c0_i32 : i32, i32
  }
}

module attributes {stable_mosaic.version = 11 : i64} {
  func.func @cluster_softmax_kernel(%arg0: i32, %arg1: memref<8x256xf32, #tpu.memory_space<vmem>>, %arg2: memref<8x1xi32, #tpu.memory_space<vmem>>, %arg3: memref<256x128xf32, #tpu.memory_space<vmem>>, %arg4: memref<1x128xf32, #tpu.memory_space<vmem>>, %arg5: memref<128x128xf32, #tpu.memory_space<vmem>>, %arg6: memref<1x128xf32, #tpu.memory_space<vmem>>, %arg7: memref<8x128xf32, #tpu.memory_space<vmem>>) attributes {dimension_semantics = [#tpu.dimension_semantics<parallel>], iteration_bounds = array<i64: 1>, scalar_prefetch = 0 : i64, scratch_operands = 0 : i64, tpu.core_type = #tpu.core_type<tc>, window_params = [{transform_indices = @transform_0, window_bounds = array<i64: 8, 256>}, {transform_indices = @transform_1, window_bounds = array<i64: 8, 1>}, {pipeline_mode = #tpu.pipeline_mode<synchronous>, transform_indices = @transform_2, window_bounds = array<i64: 256, 128>}, {pipeline_mode = #tpu.pipeline_mode<synchronous>, transform_indices = @transform_3, window_bounds = array<i64: 1, 128>}, {pipeline_mode = #tpu.pipeline_mode<synchronous>, transform_indices = @transform_4, window_bounds = array<i64: 128, 128>}, {pipeline_mode = #tpu.pipeline_mode<synchronous>, transform_indices = @transform_5, window_bounds = array<i64: 1, 128>}, {transform_indices = @transform_6, window_bounds = array<i64: 8, 128>}]} {
    %c0 = arith.constant 0 : index
    %c0_0 = arith.constant 0 : index
    %0 = vector.load %arg1[%c0, %c0_0] : memref<8x256xf32, #tpu.memory_space<vmem>>, vector<8x256xf32>
    %1 = tpu.iota {dimensions = array<i32: 1>} : vector<8x256xi32>
    %c128_i32 = arith.constant 128 : i32
    %2 = vector.broadcast %c128_i32 : i32 to vector<8x256xi32>
    %3 = arith.cmpi slt, %1, %2 : vector<8x256xi32>
    %4 = arith.mulf %0, %0 : vector<8x256xf32>
    %cst = arith.constant 0.000000e+00 : f32
    %5 = vector.broadcast %cst : f32 to vector<8x256xf32>
    %6 = arith.select %3, %4, %5 : vector<8x256xi1>, vector<8x256xf32>
    %cst_1 = arith.constant dense<0.000000e+00> : vector<8xf32>
    %7 = vector.multi_reduction <add>, %6, %cst_1 [1] : vector<8x256xf32> to vector<8xf32>
    %8 = vector.shape_cast %7 : vector<8xf32> to vector<8x1xf32>
    %cst_2 = arith.constant 0.000000e+00 : f32
    %9 = vector.broadcast %cst_2 : f32 to vector<8x256xf32>
    %10 = arith.select %3, %9, %4 : vector<8x256xi1>, vector<8x256xf32>
    %cst_3 = arith.constant dense<0.000000e+00> : vector<8xf32>
    %11 = vector.multi_reduction <add>, %10, %cst_3 [1] : vector<8x256xf32> to vector<8xf32>
    %12 = vector.shape_cast %11 : vector<8xf32> to vector<8x1xf32>
    %cst_4 = arith.constant 1.000000e-24 : f32
    %13 = vector.broadcast %cst_4 : f32 to vector<8x1xf32>
    %14 = arith.maximumf %8, %13 : vector<8x1xf32>
    %15 = math.rsqrt %14 : vector<8x1xf32>
    %cst_5 = arith.constant 1.000000e-24 : f32
    %16 = vector.broadcast %cst_5 : f32 to vector<8x1xf32>
    %17 = arith.maximumf %12, %16 : vector<8x1xf32>
    %18 = math.rsqrt %17 : vector<8x1xf32>
    %19 = vector.shape_cast %15 : vector<8x1xf32> to vector<8x1xf32>
    %20 = vector.broadcast %19 : vector<8x1xf32> to vector<8x256xf32>
    %21 = vector.shape_cast %18 : vector<8x1xf32> to vector<8x1xf32>
    %22 = vector.broadcast %21 : vector<8x1xf32> to vector<8x256xf32>
    %23 = arith.select %3, %20, %22 : vector<8x256xi1>, vector<8x256xf32>
    %24 = arith.mulf %0, %23 : vector<8x256xf32>
    %c0_6 = arith.constant 0 : index
    %c0_7 = arith.constant 0 : index
    %25 = vector.load %arg3[%c0_6, %c0_7] : memref<256x128xf32, #tpu.memory_space<vmem>>, vector<256x128xf32>
    %cst_8 = arith.constant dense<0.000000e+00> : vector<8x128xf32>
    %26 = tpu.matmul %24, %25, %cst_8 {dimension_numbers = #tpu.dot_dimension_numbers<[1], [0], [0], [1], [0, 0, 1, 1], [], []>} : vector<8x256xf32>, vector<256x128xf32>, vector<8x128xf32> -> vector<8x128xf32>
    %c0_9 = arith.constant 0 : index
    %c0_10 = arith.constant 0 : index
    %27 = vector.load %arg4[%c0_9, %c0_10] : memref<1x128xf32, #tpu.memory_space<vmem>>, vector<1x128xf32>
    %28 = vector.broadcast %27 : vector<1x128xf32> to vector<8x128xf32>
    %29 = arith.addf %26, %28 : vector<8x128xf32>
    %cst_11 = arith.constant 0.000000e+00 : f32
    %30 = vector.broadcast %cst_11 : f32 to vector<8x128xf32>
    %31 = arith.maximumf %29, %30 : vector<8x128xf32>
    %c0_12 = arith.constant 0 : index
    %c0_13 = arith.constant 0 : index
    %32 = vector.load %arg5[%c0_12, %c0_13] : memref<128x128xf32, #tpu.memory_space<vmem>>, vector<128x128xf32>
    %cst_14 = arith.constant dense<0.000000e+00> : vector<8x128xf32>
    %33 = tpu.matmul %31, %32, %cst_14 {dimension_numbers = #tpu.dot_dimension_numbers<[1], [0], [0], [1], [0, 0, 1, 1], [], []>} : vector<8x128xf32>, vector<128x128xf32>, vector<8x128xf32> -> vector<8x128xf32>
    %c0_15 = arith.constant 0 : index
    %c0_16 = arith.constant 0 : index
    %34 = vector.load %arg6[%c0_15, %c0_16] : memref<1x128xf32, #tpu.memory_space<vmem>>, vector<1x128xf32>
    %35 = vector.broadcast %34 : vector<1x128xf32> to vector<8x128xf32>
    %36 = arith.addf %33, %35 : vector<8x128xf32>
    %c0_17 = arith.constant 0 : index
    %c0_18 = arith.constant 0 : index
    %37 = vector.load %arg2[%c0_17, %c0_18] : memref<8x1xi32, #tpu.memory_space<vmem>>, vector<8x1xi32>
    %38 = tpu.iota {dimensions = array<i32: 1>} : vector<8x128xi32>
    %39 = vector.broadcast %37 : vector<8x1xi32> to vector<8x128xi32>
    %40 = arith.cmpi eq, %38, %39 : vector<8x128xi32>
    %41 = arith.extui %40 : vector<8x128xi1> to vector<8x128xi32>
    %42 = arith.sitofp %41 : vector<8x128xi32> to vector<8x128xf32>
    %cst_19 = arith.constant 3.000000e+01 : f32
    %43 = vector.broadcast %cst_19 : f32 to vector<8x128xf32>
    %44 = arith.mulf %43, %36 : vector<8x128xf32>
    %cst_20 = arith.constant 1.050000e+01 : f32
    %45 = vector.broadcast %cst_20 : f32 to vector<8x128xf32>
    %46 = arith.mulf %45, %42 : vector<8x128xf32>
    %47 = arith.subf %44, %46 : vector<8x128xf32>
    %cst_21 = arith.constant dense<0xFF800000> : vector<8xf32>
    %48 = vector.multi_reduction <maximumf>, %47, %cst_21 [1] : vector<8x128xf32> to vector<8xf32>
    %49 = vector.shape_cast %48 : vector<8xf32> to vector<8x1xf32>
    %50 = vector.broadcast %49 : vector<8x1xf32> to vector<8x128xf32>
    %51 = arith.subf %47, %50 : vector<8x128xf32>
    %52 = math.exp %51 : vector<8x128xf32>
    %cst_22 = arith.constant dense<0.000000e+00> : vector<8xf32>
    %53 = vector.multi_reduction <add>, %52, %cst_22 [1] : vector<8x128xf32> to vector<8xf32>
    %54 = vector.shape_cast %53 : vector<8xf32> to vector<8x1xf32>
    %55 = math.log %54 : vector<8x1xf32>
    %c0_i32 = arith.constant 0 : i32
    %56 = vector.broadcast %c0_i32 : i32 to vector<8x1xi32>
    %57 = arith.cmpi sge, %37, %56 : vector<8x1xi32>
    %58 = arith.extui %57 : vector<8x1xi1> to vector<8x1xi32>
    %59 = arith.sitofp %58 : vector<8x1xi32> to vector<8x1xf32>
    %60 = arith.mulf %51, %42 : vector<8x128xf32>
    %cst_23 = arith.constant dense<0.000000e+00> : vector<8xf32>
    %61 = vector.multi_reduction <add>, %60, %cst_23 [1] : vector<8x128xf32> to vector<8xf32>
    %62 = vector.shape_cast %61 : vector<8xf32> to vector<8x1xf32>
    %63 = arith.mulf %55, %59 : vector<8x1xf32>
    %64 = arith.subf %62, %63 : vector<8x1xf32>
    %cst_24 = arith.constant dense<0.000000e+00> : vector<1xf32>
    %65 = vector.multi_reduction <add>, %64, %cst_24 [0] : vector<8x1xf32> to vector<1xf32>
    %66 = vector.shape_cast %65 : vector<1xf32> to vector<1x1xf32>
    %cst_25 = arith.constant 0.000000e+00 : f32
    %67 = vector.broadcast %cst_25 : f32 to vector<1x1xf32>
    %68 = arith.subf %67, %66 : vector<1x1xf32>
    %69 = vector.broadcast %49 : vector<8x1xf32> to vector<8x128xf32>
    %70 = arith.cmpf oeq, %47, %69 : vector<8x128xf32>
    %c128_i32_26 = arith.constant 128 : i32
    %71 = vector.broadcast %c128_i32_26 : i32 to vector<8x128xi32>
    %72 = arith.select %70, %38, %71 : vector<8x128xi1>, vector<8x128xi32>
    %cst_27 = arith.constant dense<2147483647> : vector<8xi32>
    %73 = vector.multi_reduction <minsi>, %72, %cst_27 [1] : vector<8x128xi32> to vector<8xi32>
    %74 = vector.shape_cast %73 : vector<8xi32> to vector<8x1xi32>
    %75 = arith.cmpi eq, %74, %37 : vector<8x1xi32>
    %76 = arith.extui %75 : vector<8x1xi1> to vector<8x1xi32>
    %77 = arith.sitofp %76 : vector<8x1xi32> to vector<8x1xf32>
    %cst_28 = arith.constant dense<0.000000e+00> : vector<1xf32>
    %78 = vector.multi_reduction <add>, %77, %cst_28 [0] : vector<8x1xf32> to vector<1xf32>
    %79 = vector.shape_cast %78 : vector<1xf32> to vector<1x1xf32>
    %80 = tpu.iota {dimensions = array<i32: 0>} : vector<8x128xi32>
    %81 = tpu.iota {dimensions = array<i32: 1>} : vector<8x128xi32>
    %c0_i32_29 = arith.constant 0 : i32
    %82 = vector.broadcast %c0_i32_29 : i32 to vector<8x128xi32>
    %83 = arith.cmpi eq, %80, %82 : vector<8x128xi32>
    %c0_i32_30 = arith.constant 0 : i32
    %84 = vector.broadcast %c0_i32_30 : i32 to vector<8x128xi32>
    %85 = arith.cmpi eq, %81, %84 : vector<8x128xi32>
    %86 = arith.andi %83, %85 : vector<8x128xi1>
    %c0_i32_31 = arith.constant 0 : i32
    %87 = vector.broadcast %c0_i32_31 : i32 to vector<8x128xi32>
    %88 = arith.cmpi eq, %80, %87 : vector<8x128xi32>
    %c1_i32 = arith.constant 1 : i32
    %89 = vector.broadcast %c1_i32 : i32 to vector<8x128xi32>
    %90 = arith.cmpi eq, %81, %89 : vector<8x128xi32>
    %91 = arith.andi %88, %90 : vector<8x128xi1>
    %cst_32 = arith.constant 0.000000e+00 : f32
    %92 = vector.shape_cast %79 : vector<1x1xf32> to vector<1x1xf32>
    %93 = vector.broadcast %92 : vector<1x1xf32> to vector<8x128xf32>
    %94 = vector.broadcast %cst_32 : f32 to vector<8x128xf32>
    %95 = arith.select %91, %93, %94 : vector<8x128xi1>, vector<8x128xf32>
    %96 = vector.shape_cast %68 : vector<1x1xf32> to vector<1x1xf32>
    %97 = vector.broadcast %96 : vector<1x1xf32> to vector<8x128xf32>
    %98 = arith.select %86, %97, %95 : vector<8x128xi1>, vector<8x128xf32>
    %c0_33 = arith.constant 0 : index
    %c0_34 = arith.constant 0 : index
    %99 = vector.load %arg7[%c0_33, %c0_34] : memref<8x128xf32, #tpu.memory_space<vmem>>, vector<8x128xf32>
    tpu.vector_store %arg7[%c0_33, %c0_34], %98 {strides = array<i32>} : memref<8x128xf32, #tpu.memory_space<vmem>>, vector<8x128xf32>,
    return
  }
  func.func @transform_0(%arg0: i32) -> (i32, i32) {
    %c0_i32 = arith.constant 0 : i32
    %c0_i32_0 = arith.constant 0 : i32
    return %arg0, %c0_i32 : i32, i32
  }
  func.func @transform_1(%arg0: i32) -> (i32, i32) {
    %c0_i32 = arith.constant 0 : i32
    %c0_i32_0 = arith.constant 0 : i32
    return %arg0, %c0_i32 : i32, i32
  }
  func.func @transform_2(%arg0: i32) -> (i32, i32) {
    %c0_i32 = arith.constant 0 : i32
    %c0_i32_0 = arith.constant 0 : i32
    %c0_i32_1 = arith.constant 0 : i32
    return %c0_i32, %c0_i32_0 : i32, i32
  }
  func.func @transform_3(%arg0: i32) -> (i32, i32) {
    %c0_i32 = arith.constant 0 : i32
    %c0_i32_0 = arith.constant 0 : i32
    %c0_i32_1 = arith.constant 0 : i32
    return %c0_i32, %c0_i32_0 : i32, i32
  }
  func.func @transform_4(%arg0: i32) -> (i32, i32) {
    %c0_i32 = arith.constant 0 : i32
    %c0_i32_0 = arith.constant 0 : i32
    %c0_i32_1 = arith.constant 0 : i32
    return %c0_i32, %c0_i32_0 : i32, i32
  }
  func.func @transform_5(%arg0: i32) -> (i32, i32) {
    %c0_i32 = arith.constant 0 : i32
    %c0_i32_0 = arith.constant 0 : i32
    %c0_i32_1 = arith.constant 0 : i32
    return %c0_i32, %c0_i32_0 : i32, i32
  }
  func.func @transform_6(%arg0: i32) -> (i32, i32) {
    %c0_i32 = arith.constant 0 : i32
    %c0_i32_0 = arith.constant 0 : i32
    return %arg0, %c0_i32 : i32, i32
  }
}

</mosaic_0001>

<bundles_post_ra>
// kernel: tpu_custom_call.1
= control target key start
LH: loop header
LB: loop body
LE: loop exit
PB: predicated region body
PF: predicated region fallthrough
CT: control target
= control target key end

     0   :  { %11 = vsyncpa [#allocation3], 0  ;;  %s691_s0 = inlined_call_operand.hbm [shape: f32[8,256], index: 0, kind: input, shape index: {}]   ;;  %s692_s1 = inlined_call_operand.vmem [shape: s32[8,1], index: 1, kind: input, shape index: {}]   ;;  %s693_s2 = inlined_call_operand.hbm [shape: f32[256,128], index: 2, kind: input, shape index: {}]   ;;  %s694_s3 = inlined_call_operand.vmem [shape: f32[1,128], index: 3, kind: input, shape index: {}]   ;;  %s695_s4 = inlined_call_operand.hbm [shape: f32[128,128], index: 4, kind: input, shape index: {}]   ;;  %s696_s5 = inlined_call_operand.vmem [shape: f32[1,128], index: 5, kind: input, shape index: {}]   ;;  %s697_s6 = inlined_call_operand.hbm [shape: f32[8,128], index: 6, kind: output, shape index: {}]  }
   0x1   :  { %12 = vsyncpa [#allocation6], 0 }
   0x2   :  { %13 = vsyncpa [#allocation4], 0  ;;  %s588_s21 = smov [#allocation5]  }
   0x3   :  { %s31_s22 = sshll.u32 %s588_s21, 4  ;;  %s32_s22 = int_to_ptr.vmem [resolvable:$true] %s31_s22 }
   0x4   :  { %s510_s23 = scalar_lea.vmem %s32_s22, 4096  ;;  %p515_p1 = scmp.lt.s32.totalorder %s32_s22, %s32_s22 }
   0x5   :  { %p511_p0 = scmp.ne.s32.totalorder %s32_s22, %s510_s23  ;;  %p516_p2 = scmp.lt.s32.totalorder %s510_s23, %s510_s23 }
   0x7   :  { %p517_p3 = por %p516_p2, %p515_p1 }
   0x9   :  { %p518_p4 = pnand %p517_p3, %p511_p0 }
   0xb   :  { %521 = shalt.err (!%p518_p4)
}
   0xc   :  { %s589_s24 = smov 128   ;;  %s590_s25 = smov 8  }
   0xd   :  { %37 = dma.hbm_to_vmem [thread:$0]  %s693_s2, 4096, %s32_s22, [#allocation6], %s589_s24, %s589_s24, %s590_s25  }
   0xe   :  { %s591_s28 = smov [#allocation2]   ;;  %s592_s30 = smov [#allocation7]  }
   0xf   :  { %s20_s29 = sshll.u32 %s591_s28, 4  ;;  %s45_s7 = sshll.u32 %s592_s30, 4  ;;  %s21_s29 = int_to_ptr.vmem [resolvable:$true] %s20_s29  ;;  %s46_s7 = int_to_ptr.vmem [resolvable:$true] %s45_s7 }
  0x10   :  { %s530_s8 = scalar_lea.vmem %s21_s29, 256  ;;  %p535_p6 = scmp.lt.s32.totalorder %s21_s29, %s21_s29 }
  0x11   :  { %p531_p5 = scmp.ne.s32.totalorder %s21_s29, %s530_s8  ;;  %p536_p7 = scmp.lt.s32.totalorder %s530_s8, %s530_s8 }
  0x13   :  { %p537_p8 = por %p536_p7, %p535_p6 }
  0x15   :  { %p538_p9 = pnand %p537_p8, %p531_p5 }
  0x17   :  { %541 = shalt.err (!%p538_p9)
}
  0x18   :  { %23 = dma.hbm_to_vmem [thread:$0]  %s691_s0, 256, %s21_s29, [#allocation3]  }
  0x19   :  { %s550_s11 = scalar_lea.vmem %s46_s7, 2048  ;;  %p555_p11 = scmp.lt.s32.totalorder %s46_s7, %s46_s7 }
  0x1a   :  { %p551_p10 = scmp.ne.s32.totalorder %s46_s7, %s550_s11  ;;  %p556_p12 = scmp.lt.s32.totalorder %s550_s11, %s550_s11 }
  0x1c   :  { %p557_p13 = por %p556_p12, %p555_p11 }
  0x1e   :  { %p558_p0 = pnand %p557_p13, %p551_p10 }
  0x20   :  { %561 = shalt.err (!%p558_p0)
}
  0x21   :  { %51 = dma.hbm_to_vmem [thread:$0]  %s695_s4, 2048, %s46_s7, [#allocation6], %s589_s24, %s589_s24, %s590_s25  }
  0x22   :  { %582 = dma.done.wait [#allocation3], 256  }
  0x23   :  { %583 = vsyncadd [#allocation3], 4294967040 }
  0x24   :  { %584 = dma.done.wait [#allocation6], 6144  }
  0x25   :  { %585 = vsyncadd [#allocation6], 4294961152  ;;  %v641_v0 = vld [vmem:[#allocation2 + $0x8] sm:$0xff]  ;;  %v643_v1 = vld [vmem:[#allocation2] sm:$0xff]  ;;  %v593_v37 = vmov 0.0   ;;  %vm594_vm0 = vmmov 0  }
  0x26   :  { %v121_v2 = vld [vmem:[#allocation5 + $0xf8] sm:$0xff]  ;;  %v71_v3 = vmul.f32 %v641_v0, %v641_v0  ;;  %v120_v5 = vld [vmem:[#allocation5 + $0xf0] sm:$0xff]  ;;  %v119_v7 = vld [vmem:[#allocation5 + $0xe8] sm:$0xff]  ;;  %v70_v8 = vmul.f32 %v643_v1, %v643_v1  ;;  %448 = vmatprep.subr.mxu1 %v593_v37  ;;  %480 = vmatprep.mubr.msk.f32.mxu1 %vm594_vm0, %v593_v37  ;;  %v595_v62 = vmov 0   ;;  %vm320_vm5 = vcmask 7168  }
  0x27   :  { %396 = vmatprep.subr.mxu0 %v121_v2  ;;  %v105_v4 = vld [vmem:[#allocation5 + $0x78] sm:$0xff]  ;;  %v104_v6 = vld [vmem:[#allocation5 + $0x70] sm:$0xff]  ;;  %v103_v9 = vld [vmem:[#allocation5 + $0x68] sm:$0xff]  ;;  %492 = vset.pattern.permute.xlu1 %v595_v62 }
  0x28   :  { %397 = vmatpush3.msra.mxu0 %v105_v4  ;;  %80 = vadd.xlane.f32.xlu0 %v71_v3  ;;  %v118_v10 = vld [vmem:[#allocation5 + $0xe0] sm:$0xff]  ;;  %v117_v12 = vld [vmem:[#allocation5 + $0xd8] sm:$0xff]  ;;  %v116_v14 = vld [vmem:[#allocation5 + $0xd0] sm:$0xff] }
  0x29   :  { %398 = vmatprep.subr.mxu0 %v120_v5  ;;  %v102_v11 = vld [vmem:[#allocation5 + $0x60] sm:$0xff]  ;;  %v101_v13 = vld [vmem:[#allocation5 + $0x58] sm:$0xff]  ;;  %v100_v15 = vld [vmem:[#allocation5 + $0x50] sm:$0xff]  ;;  %493 = vset.pattern.permute.xlu0 %v595_v62  ;;  %v65_v5 = vlaneseq }
  0x2a   :  { %399 = vmatpush3.msra.mxu0 %v104_v6  ;;  %v115_v16 = vld [vmem:[#allocation5 + $0xc8] sm:$0xff]  ;;  %v114_v18 = vld [vmem:[#allocation5 + $0xc0] sm:$0xff]  ;;  %v113_v20 = vld [vmem:[#allocation5 + $0xb8] sm:$0xff] }
  0x2b   :  { %400 = vmatprep.subr.mxu0 %v119_v7  ;;  %v99_v17 = vld [vmem:[#allocation5 + $0x48] sm:$0xff]  ;;  %v98_v19 = vld [vmem:[#allocation5 + $0x40] sm:$0xff]  ;;  %v97_v21 = vld [vmem:[#allocation5 + $0x38] sm:$0xff]  ;;  %v675_v6 = vand.u32 127, %v65_v5 }
  0x2c   :  { %401 = vmatpush3.msra.mxu0 %v103_v9  ;;  %75 = vadd.xlane.f32.xlu0 %v70_v8  ;;  %v112_v22 = vld [vmem:[#allocation5 + $0xb0] sm:$0xff]  ;;  %v111_v24 = vld [vmem:[#allocation5 + $0xa8] sm:$0xff]  ;;  %v110_v26 = vld [vmem:[#allocation5 + $0xa0] sm:$0xff] }
  0x2d   :  { %402 = vmatprep.subr.mxu0 %v118_v10  ;;  %v96_v23 = vld [vmem:[#allocation5 + $0x30] sm:$0xff]  ;;  %v95_v25 = vld [vmem:[#allocation5 + $0x28] sm:$0xff]  ;;  %v94_v27 = vld [vmem:[#allocation5 + $0x20] sm:$0xff]  ;;  %vm360_vm8 = vcmp.eq.s32.totalorder %v675_v6, 1  ;;  %vm358_vm9 = vcmp.eq.s32.totalorder %v675_v6, 0 }
  0x2e   :  { %403 = vmatpush3.msra.mxu0 %v102_v11  ;;  %v109_v28 = vld [vmem:[#allocation5 + $0x98] sm:$0xff]  ;;  %v108_v30 = vld [vmem:[#allocation5 + $0x90] sm:$0xff]  ;;  %v107_v32 = vld [vmem:[#allocation5 + $0x88] sm:$0xff] }
  0x2f   :  { %404 = vmatprep.subr.mxu0 %v117_v12  ;;  %v93_v29 = vld [vmem:[#allocation5 + $0x18] sm:$0xff]  ;;  %v92_v31 = vld [vmem:[#allocation5 + $0x10] sm:$0xff]  ;;  %v91_v33 = vld [vmem:[#allocation5 + $0x8] sm:$0xff] }
  0x30   :  { %405 = vmatpush3.msra.mxu0 %v101_v13  ;;  %v106_v34 = vld [vmem:[#allocation5 + $0x80] sm:$0xff]  ;;  %v215_v36 = vld [vmem:[#allocation7 + $0x78] sm:$0xff]  ;;  %v214_v38 = vld [vmem:[#allocation7 + $0x70] sm:$0xff] }
  0x31   :  { %406 = vmatprep.subr.mxu0 %v116_v14  ;;  %v90_v35 = vld [vmem:[#allocation5] sm:$0xff]  ;;  %449 = vmatpush3.msra.mxu1 %v215_v36  ;;  %v213_v39 = vld [vmem:[#allocation7 + $0x68] sm:$0xff]  ;;  %v211_v41 = vld [vmem:[#allocation7 + $0x58] sm:$0xff] }
  0x32   :  { %407 = vmatpush3.msra.mxu0 %v100_v15  ;;  %450 = vmatprep.subr.mxu1 %v593_v37  ;;  %v212_v40 = vld [vmem:[#allocation7 + $0x60] sm:$0xff]  ;;  %v210_v42 = vld [vmem:[#allocation7 + $0x50] sm:$0xff]  ;;  %v209_v43 = vld [vmem:[#allocation7 + $0x48] sm:$0xff] }
  0x33   :  { %408 = vmatprep.subr.mxu0 %v115_v16  ;;  %451 = vmatpush3.msra.mxu1 %v214_v38  ;;  %v208_v44 = vld [vmem:[#allocation7 + $0x40] sm:$0xff]  ;;  %v207_v45 = vld [vmem:[#allocation7 + $0x38] sm:$0xff]  ;;  %v206_v46 = vld [vmem:[#allocation7 + $0x30] sm:$0xff] }
  0x34   :  { %409 = vmatpush3.msra.mxu0 %v99_v17  ;;  %452 = vmatprep.subr.mxu1 %v593_v37  ;;  %v205_v47 = vld [vmem:[#allocation7 + $0x28] sm:$0xff]  ;;  %v204_v56 = vld [vmem:[#allocation7 + $0x20] sm:$0xff]  ;;  %v203_v57 = vld [vmem:[#allocation7 + $0x18] sm:$0xff] }
  0x35   :  { %410 = vmatprep.subr.mxu0 %v114_v18  ;;  %453 = vmatpush3.msra.mxu1 %v213_v39  ;;  %v202_v58 = vld [vmem:[#allocation7 + $0x10] sm:$0xff]  ;;  %v201_v59 = vld [vmem:[#allocation7 + $0x8] sm:$0xff]  ;;  %v200_v60 = vld [vmem:[#allocation7] sm:$0xff] }
  0x36   :  { %411 = vmatpush3.msra.mxu0 %v98_v19  ;;  %454 = vmatprep.subr.mxu1 %v593_v37  ;;  %v293_v61 = vld [vmem:[%s692_s1] sm:$0xff] }
  0x37   :  { %412 = vmatprep.subr.mxu0 %v113_v20  ;;  %455 = vmatpush3.msra.mxu1 %v212_v40  ;;  %v392_v9 = vld [vmem:[%s696_s5] ss:$0 sm:$0xff]  ;;  %vm312_vm4 = vcmp.ge.s32.totalorder %v293_v61, 0 }
  0x38   :  { %413 = vmatpush3.msra.mxu0 %v97_v21  ;;  %456 = vmatprep.subr.mxu1 %v593_v37 }
  0x39   :  { %414 = vmatprep.subr.mxu0 %v112_v22  ;;  %457 = vmatpush3.msra.mxu1 %v211_v41 }
  0x3a   :  { %415 = vmatpush3.msra.mxu0 %v96_v23  ;;  %458 = vmatprep.subr.mxu1 %v593_v37 }
  0x3b   :  { %416 = vmatprep.subr.mxu0 %v111_v24  ;;  %459 = vmatpush3.msra.mxu1 %v210_v42 }
  0x3c   :  { %417 = vmatpush3.msra.mxu0 %v95_v25  ;;  %460 = vmatprep.subr.mxu1 %v593_v37 }
  0x3d   :  { %418 = vmatprep.subr.mxu0 %v110_v26  ;;  %461 = vmatpush3.msra.mxu1 %v209_v43 }
  0x3e   :  { %419 = vmatpush3.msra.mxu0 %v94_v27  ;;  %462 = vmatprep.subr.mxu1 %v593_v37 }
  0x3f   :  { %420 = vmatprep.subr.mxu0 %v109_v28  ;;  %463 = vmatpush3.msra.mxu1 %v208_v44 }
  0x40   :  { %421 = vmatpush3.msra.mxu0 %v93_v29  ;;  %464 = vmatprep.subr.mxu1 %v593_v37 }
  0x41   :  { %422 = vmatprep.subr.mxu0 %v108_v30  ;;  %465 = vmatpush3.msra.mxu1 %v207_v45 }
  0x42   :  { %423 = vmatpush3.msra.mxu0 %v92_v31  ;;  %466 = vmatprep.subr.mxu1 %v593_v37 }
  0x43   :  { %424 = vmatprep.subr.mxu0 %v107_v32  ;;  %467 = vmatpush3.msra.mxu1 %v206_v46 }
  0x44   :  { %425 = vmatpush3.msra.mxu0 %v91_v33  ;;  %468 = vmatprep.subr.mxu1 %v593_v37  ;;  %v394_v33 = vsel %vm312_vm4, 1.0, %v593_v37 }
  0x45   :  { %426 = vmatprep.subr.mxu0 %v106_v34  ;;  %469 = vmatpush3.msra.mxu1 %v205_v47 }
  0x46   :  { %427 = vmatpush3.msra.mxu0 %v90_v35  ;;  %470 = vmatprep.subr.mxu1 %v593_v37 }
  0x47   :  { %471 = vmatpush3.msra.mxu1 %v204_v56  ;;  %295 = vperm.xlu1 %492, %v293_v61  }
  0x48   :  { %472 = vmatprep.subr.mxu1 %v593_v37 }
  0x49   :  { %473 = vmatpush3.msra.mxu1 %v203_v57  ;;  %v356_v57 = vshrl.u32 %v65_v5, 7 }
  0x4a   :  { %474 = vmatprep.subr.mxu1 %v593_v37 }
  0x4b   :  { %475 = vmatpush3.msra.mxu1 %v202_v58  ;;  %vm357_vm7 = vcmp.eq.s32.totalorder %v356_v57, 0 }
  0x4c   :  { %476 = vmatprep.subr.mxu1 %v593_v37  ;;  %vm361_vm10 = vmand %vm357_vm7, %vm360_vm8 }
  0x4d   :  { %477 = vmatpush3.msra.mxu1 %v201_v59  ;;  %vm359_vm11 = vmand %vm357_vm7, %vm358_vm9 }
  0x4e   :  { %478 = vmatprep.subr.mxu1 %v593_v37 }
  0x4f   :  { %479 = vmatpush3.msra.mxu1 %v200_v60 }
  0xb1   :  { %v81_v48 = vpop.xlane.xlu0 %80 }
  0xb2   :  { %v84_v49 = vmax.f32 %v81_v48, 1e-24 }
  0xb4   :  { %494 = vrsqrt.f32 %v84_v49 }
  0xb5   :  { %v76_v50 = vpop.xlane.xlu0 %75 }
  0xb6   :  { %v82_v51 = vmax.f32 %v76_v50, 1e-24 }
  0xb8   :  { %496 = vrsqrt.f32 %v82_v51 }
  0xc1   :  { %v495_v52 = vpop.eup %494 }
  0xc2   :  { %v89_v53 = vmul.f32 %v495_v52, %v641_v0  ;;  %v391_v0 = vld [vmem:[%s694_s3] ss:$0 sm:$0xff]  ;;  %v296_v7 = vpop.permute.xlu1 %295  ;;  %s596_s3 = smov [#allocation8]  }
  0xc3   :  { %vm297_vm1 = vcmp.eq.s32.totalorder %v675_v6, %v296_v7  ;;  %s381_s5 = sshll.u32 %s596_s3, 4  ;;  %s382_s5 = int_to_ptr.vmem [resolvable:$true] %s381_s5 }
  0xc4   :  { %193 = vmatprep.mubr.f32.mxu0 %v89_v53  ;;  %v393_v8 = vsel %vm297_vm1, 1.0, %v593_v37  ;;  %s562_s16 = scalar_lea.vmem %s382_s5, 128  ;;  %p567_p2 = scmp.lt.s32.totalorder %s382_s5, %s382_s5 }
  0xc5   :  { %v497_v54 = vpop.eup %496  ;;  %v301_v11 = vmul.f32 10.5, %v393_v8  ;;  %p563_p1 = scmp.ne.s32.totalorder %s382_s5, %s562_s16  ;;  %p568_p3 = scmp.lt.s32.totalorder %s562_s16, %s562_s16 }
  0xc6   :  { %v88_v55 = vmul.f32 %v497_v54, %v643_v1 }
  0xc7   :  { %p569_p4 = por %p568_p3, %p567_p2 }
  0xc8   :  { %194 = vmatmul.mubr.f32.vlgmr.msra.gmra.mxu0 %v88_v55 }
  0xc9   :  { %p570_p5 = pnand %p569_p4, %p563_p1 }
 0x188   :  { %v428_v63 = vpop.f32.mrf.mxu0 }
 0x18a   :  { %v429_v1 = vpop.f32.mrf.mxu0 }
 0x18b   :  { %v430_v2 = vadd.f32 %v429_v1, %v428_v63 }
 0x18d   :  { %v196_v3 = vadd.f32 %v430_v2, %v391_v0 }
 0x18f   :  { %v199_v4 = vmax.f32 %v196_v3, 0.0 }
 0x191   :  { %481 = vmatmul.mubr.f32.vlgmr.msra.gmra.mxu1 %v199_v4 }
 0x251   :  { %v289_v10 = vpop.f32.mrf.mxu1 }
 0x252   :  { %v290_v12 = vadd.f32 %v392_v9, %v289_v10 }
 0x253   :  { %v482_v13 = vpop.f32.mrf.mxu1 }
 0x254   :  { %v300_v14 = vmul.f32 30.0, %v290_v12 }
 0x256   :  { %v302_v15 = vsub.f32 %v300_v14, %v301_v11 }
 0x258   :  { %303 = vmax.xlane.f32.xlu1 %v302_v15 }
 0x2e1   :  { %v304_v16 = vpop.xlane.xlu1 %303 }
 0x2e2   :  { %v305_v17 = vsub.f32 %v302_v15, %v304_v16  ;;  %vm329_vm2 = vcmp.eq.f32.partialorder %v302_v15, %v304_v16 }
 0x2e3   :  { %v330_v18 = vsel %vm329_vm2, %v675_v6, 128 }
 0x2e4   :  { %v306_v19 = vmul.f32 1.442695, %v305_v17  ;;  %v332_v20 = vshra.s32 %v330_v18, 16  ;;  %v331_v23 = vand.u32 65535, %v330_v18  ;;  %v315_v27 = vmul.f32 %v393_v8, %v305_v17 }
 0x2e6   :  { %498 = vpow2.f32 %v306_v19  ;;  %v334_v21 = vcvt.s32.f32 %v332_v20  ;;  %v333_v25 = vcvt.s32.f32 %v331_v23 }
 0x2e8   :  { %335 = vmin.xlane.f32.xlu0 %v334_v21 }
 0x2f3   :  { %v499_v22 = vpop.eup %498 }
 0x2f4   :  { %308 = vadd.xlane.f32.xlu0 %v499_v22 }
 0x371   :  { %v336_v24 = vpop.xlane.xlu0 %335 }
 0x372   :  { %vm337_vm3 = vcmp.eq.f32.partialorder %v334_v21, %v336_v24  ;;  %v342_v30 = vcvt.f32.s32 %v336_v24 }
 0x373   :  { %v338_v26 = vsel %vm337_vm3, %v333_v25, inf }
 0x374   :  { %339 = vmin.xlane.f32.xlu0 %v338_v26  ;;  %v343_v34 = vshll.u32 %v342_v30, 16 }
 0x378   :  { %316 = vadd.xlane.f32.xlu0 %v315_v27 }
 0x37d   :  { %v309_v28 = vpop.xlane.xlu0 %308 }
 0x37e   :  { %500 = vlog2.f32 %v309_v28 }
 0x38b   :  { %v501_v29 = vpop.eup %500 }
 0x38c   :  { %v311_v31 = vmul.f32 0.6931472, %v501_v29 }
 0x38e   :  { %v318_v38 = vmul.f32 %v394_v33, %v311_v31 }
 0x3fd   :  { %v340_v32 = vpop.xlane.xlu0 %339 }
 0x3fe   :  { %v341_v35 = vcvt.f32.s32 %v340_v32 }
 0x400   :  { %v344_v36 = vadd.s32 %v343_v34, %v341_v35 }
 0x401   :  { %v317_v39 = vpop.xlane.xlu0 %316 }
 0x402   :  { %vm345_vm6 = vcmp.eq.s32.totalorder %v344_v36, %v293_v61  ;;  %v319_v40 = vsub.f32 %v317_v39, %v318_v38 }
 0x403   :  { %v395_v41 = vsel %vm345_vm6, 1.0, %v593_v37 }
 0x404   :  { %v348_v42 = vsel %vm320_vm5, %v395_v41, 0.0  ;;  %v321_v43 = vsel %vm320_vm5, %v319_v40, 0.0 }
 0x405   :  { %v349_v44 = vrot.slane %v348_v42, 4  ;;  %v322_v45 = vrot.slane %v321_v43, 4 }
 0x407   :  { %v350_v46 = vadd.f32 %v349_v44, %v348_v42  ;;  %v323_v47 = vadd.f32 %v322_v45, %v321_v43 }
 0x409   :  { %v351_v48 = vrot.slane %v350_v46, 2  ;;  %v324_v49 = vrot.slane %v323_v47, 2 }
 0x40b   :  { %v325_v50 = vadd.f32 %v324_v49, %v323_v47  ;;  %v352_v51 = vadd.f32 %v351_v48, %v350_v46 }
 0x40d   :  { %v353_v52 = vrot.slane %v352_v51, 1  ;;  %v326_v53 = vrot.slane %v325_v50, 1 }
 0x40f   :  { %v354_v54 = vadd.f32 %v353_v52, %v352_v51  ;;  %v327_v55 = vadd.f32 %v326_v53, %v325_v50 }
 0x411   :  { %364 = vperm.xlu0 %493, %v354_v54   ;;  %v328_v56 = vsub.f32 0.0, %v327_v55 }
 0x413   :  { %370 = vperm.xlu1 %492, %v328_v56  }
 0x48c   :  { %v365_v37 = vpop.permute.xlu0 %364 }
 0x48d   :  { %v367_v58 = vsel %vm361_vm10, %v365_v37, 0.0 }
 0x48e   :  { %v371_v59 = vpop.permute.xlu1 %370 }
 0x48f   :  { %v373_v60 = vsel %vm359_vm11, %v371_v59, %v367_v58 }
 0x490   :  { %374 = vst [vmem:[#allocation8] sm:$0xff] %v373_v60 }
 0x491   :  { %573 = shalt.err (!%p570_p5)
}
 0x492   :  { %384 = dma.vmem_to_hbm [thread:$0]  %s382_s5, 128, %s697_s6, [#allocation4]  }
 0x493   :  { %586 = dma.done.wait [#allocation4], 128  }
 0x494   :  { %587 = vsyncadd [#allocation4], 4294967168 }
 0x495   :  { %388 = vsyncpa [#allocation3], 1 }
 0x496   :  { %389 = vsyncpa [#allocation6], 1 }
 0x497   :  { %390 = vsyncpa [#allocation4], 1 }

// kernel: tpu_custom_call.1
= control target key start
LH: loop header
LB: loop body
LE: loop exit
PB: predicated region body
PF: predicated region fallthrough
CT: control target
= control target key end

     0   :  { %11 = vsyncpa [#allocation3], 0  ;;  %s691_s0 = inlined_call_operand.hbm [shape: f32[8,256], index: 0, kind: input, shape index: {}]   ;;  %s692_s1 = inlined_call_operand.vmem [shape: s32[8,1], index: 1, kind: input, shape index: {}]   ;;  %s693_s2 = inlined_call_operand.hbm [shape: f32[256,128], index: 2, kind: input, shape index: {}]   ;;  %s694_s3 = inlined_call_operand.vmem [shape: f32[1,128], index: 3, kind: input, shape index: {}]   ;;  %s695_s4 = inlined_call_operand.hbm [shape: f32[128,128], index: 4, kind: input, shape index: {}]   ;;  %s696_s5 = inlined_call_operand.vmem [shape: f32[1,128], index: 5, kind: input, shape index: {}]   ;;  %s697_s6 = inlined_call_operand.hbm [shape: f32[8,128], index: 6, kind: output, shape index: {}]  }
   0x1   :  { %12 = vsyncpa [#allocation6], 0 }
   0x2   :  { %13 = vsyncpa [#allocation4], 0  ;;  %s588_s21 = smov [#allocation5]  }
   0x3   :  { %s31_s22 = sshll.u32 %s588_s21, 4  ;;  %s32_s22 = int_to_ptr.vmem [resolvable:$true] %s31_s22 }
   0x4   :  { %s510_s23 = scalar_lea.vmem %s32_s22, 4096  ;;  %p515_p1 = scmp.lt.s32.totalorder %s32_s22, %s32_s22 }
   0x5   :  { %p511_p0 = scmp.ne.s32.totalorder %s32_s22, %s510_s23  ;;  %p516_p2 = scmp.lt.s32.totalorder %s510_s23, %s510_s23 }
   0x7   :  { %p517_p3 = por %p516_p2, %p515_p1 }
   0x9   :  { %p518_p4 = pnand %p517_p3, %p511_p0 }
   0xb   :  { %521 = shalt.err (!%p518_p4)
}
   0xc   :  { %s589_s24 = smov 128   ;;  %s590_s25 = smov 8  }
   0xd   :  { %37 = dma.hbm_to_vmem [thread:$0]  %s693_s2, 4096, %s32_s22, [#allocation6], %s589_s24, %s589_s24, %s590_s25  }
   0xe   :  { %s591_s28 = smov [#allocation2]   ;;  %s592_s30 = smov [#allocation7]  }
   0xf   :  { %s20_s29 = sshll.u32 %s591_s28, 4  ;;  %s45_s7 = sshll.u32 %s592_s30, 4  ;;  %s21_s29 = int_to_ptr.vmem [resolvable:$true] %s20_s29  ;;  %s46_s7 = int_to_ptr.vmem [resolvable:$true] %s45_s7 }
  0x10   :  { %s530_s8 = scalar_lea.vmem %s21_s29, 256  ;;  %p535_p6 = scmp.lt.s32.totalorder %s21_s29, %s21_s29 }
  0x11   :  { %p531_p5 = scmp.ne.s32.totalorder %s21_s29, %s530_s8  ;;  %p536_p7 = scmp.lt.s32.totalorder %s530_s8, %s530_s8 }
  0x13   :  { %p537_p8 = por %p536_p7, %p535_p6 }
  0x15   :  { %p538_p9 = pnand %p537_p8, %p531_p5 }
  0x17   :  { %541 = shalt.err (!%p538_p9)
}
  0x18   :  { %23 = dma.hbm_to_vmem [thread:$0]  %s691_s0, 256, %s21_s29, [#allocation3]  }
  0x19   :  { %s550_s11 = scalar_lea.vmem %s46_s7, 2048  ;;  %p555_p11 = scmp.lt.s32.totalorder %s46_s7, %s46_s7 }
  0x1a   :  { %p551_p10 = scmp.ne.s32.totalorder %s46_s7, %s550_s11  ;;  %p556_p12 = scmp.lt.s32.totalorder %s550_s11, %s550_s11 }
  0x1c   :  { %p557_p13 = por %p556_p12, %p555_p11 }
  0x1e   :  { %p558_p0 = pnand %p557_p13, %p551_p10 }
  0x20   :  { %561 = shalt.err (!%p558_p0)
}
  0x21   :  { %51 = dma.hbm_to_vmem [thread:$0]  %s695_s4, 2048, %s46_s7, [#allocation6], %s589_s24, %s589_s24, %s590_s25  }
  0x22   :  { %582 = dma.done.wait [#allocation3], 256  }
  0x23   :  { %583 = vsyncadd [#allocation3], 4294967040 }
  0x24   :  { %584 = dma.done.wait [#allocation6], 6144  }
  0x25   :  { %585 = vsyncadd [#allocation6], 4294961152  ;;  %v641_v0 = vld [vmem:[#allocation2 + $0x8] sm:$0xff]  ;;  %v643_v1 = vld [vmem:[#allocation2] sm:$0xff]  ;;  %v593_v37 = vmov 0.0   ;;  %vm594_vm0 = vmmov 0  }
  0x26   :  { %v121_v2 = vld [vmem:[#allocation5 + $0xf8] sm:$0xff]  ;;  %v71_v3 = vmul.f32 %v641_v0, %v641_v0  ;;  %v120_v5 = vld [vmem:[#allocation5 + $0xf0] sm:$0xff]  ;;  %v119_v7 = vld [vmem:[#allocation5 + $0xe8] sm:$0xff]  ;;  %v70_v8 = vmul.f32 %v643_v1, %v643_v1  ;;  %448 = vmatprep.subr.mxu1 %v593_v37  ;;  %480 = vmatprep.mubr.msk.f32.mxu1 %vm594_vm0, %v593_v37  ;;  %v595_v62 = vmov 0   ;;  %vm320_vm5 = vcmask 7168  }
  0x27   :  { %396 = vmatprep.subr.mxu0 %v121_v2  ;;  %v105_v4 = vld [vmem:[#allocation5 + $0x78] sm:$0xff]  ;;  %v104_v6 = vld [vmem:[#allocation5 + $0x70] sm:$0xff]  ;;  %v103_v9 = vld [vmem:[#allocation5 + $0x68] sm:$0xff]  ;;  %492 = vset.pattern.permute.xlu1 %v595_v62 }
  0x28   :  { %397 = vmatpush3.msra.mxu0 %v105_v4  ;;  %80 = vadd.xlane.f32.xlu0 %v71_v3  ;;  %v118_v10 = vld [vmem:[#allocation5 + $0xe0] sm:$0xff]  ;;  %v117_v12 = vld [vmem:[#allocation5 + $0xd8] sm:$0xff]  ;;  %v116_v14 = vld [vmem:[#allocation5 + $0xd0] sm:$0xff] }
  0x29   :  { %398 = vmatprep.subr.mxu0 %v120_v5  ;;  %v102_v11 = vld [vmem:[#allocation5 + $0x60] sm:$0xff]  ;;  %v101_v13 = vld [vmem:[#allocation5 + $0x58] sm:$0xff]  ;;  %v100_v15 = vld [vmem:[#allocation5 + $0x50] sm:$0xff]  ;;  %493 = vset.pattern.permute.xlu0 %v595_v62  ;;  %v65_v5 = vlaneseq }
  0x2a   :  { %399 = vmatpush3.msra.mxu0 %v104_v6  ;;  %v115_v16 = vld [vmem:[#allocation5 + $0xc8] sm:$0xff]  ;;  %v114_v18 = vld [vmem:[#allocation5 + $0xc0] sm:$0xff]  ;;  %v113_v20 = vld [vmem:[#allocation5 + $0xb8] sm:$0xff] }
  0x2b   :  { %400 = vmatprep.subr.mxu0 %v119_v7  ;;  %v99_v17 = vld [vmem:[#allocation5 + $0x48] sm:$0xff]  ;;  %v98_v19 = vld [vmem:[#allocation5 + $0x40] sm:$0xff]  ;;  %v97_v21 = vld [vmem:[#allocation5 + $0x38] sm:$0xff]  ;;  %v675_v6 = vand.u32 127, %v65_v5 }
  0x2c   :  { %401 = vmatpush3.msra.mxu0 %v103_v9  ;;  %75 = vadd.xlane.f32.xlu0 %v70_v8  ;;  %v112_v22 = vld [vmem:[#allocation5 + $0xb0] sm:$0xff]  ;;  %v111_v24 = vld [vmem:[#allocation5 + $0xa8] sm:$0xff]  ;;  %v110_v26 = vld [vmem:[#allocation5 + $0xa0] sm:$0xff] }
  0x2d   :  { %402 = vmatprep.subr.mxu0 %v118_v10  ;;  %v96_v23 = vld [vmem:[#allocation5 + $0x30] sm:$0xff]  ;;  %v95_v25 = vld [vmem:[#allocation5 + $0x28] sm:$0xff]  ;;  %v94_v27 = vld [vmem:[#allocation5 + $0x20] sm:$0xff]  ;;  %vm360_vm8 = vcmp.eq.s32.totalorder %v675_v6, 1  ;;  %vm358_vm9 = vcmp.eq.s32.totalorder %v675_v6, 0 }
  0x2e   :  { %403 = vmatpush3.msra.mxu0 %v102_v11  ;;  %v109_v28 = vld [vmem:[#allocation5 + $0x98] sm:$0xff]  ;;  %v108_v30 = vld [vmem:[#allocation5 + $0x90] sm:$0xff]  ;;  %v107_v32 = vld [vmem:[#allocation5 + $0x88] sm:$0xff] }
  0x2f   :  { %404 = vmatprep.subr.mxu0 %v117_v12  ;;  %v93_v29 = vld [vmem:[#allocation5 + $0x18] sm:$0xff]  ;;  %v92_v31 = vld [vmem:[#allocation5 + $0x10] sm:$0xff]  ;;  %v91_v33 = vld [vmem:[#allocation5 + $0x8] sm:$0xff] }
  0x30   :  { %405 = vmatpush3.msra.mxu0 %v101_v13  ;;  %v106_v34 = vld [vmem:[#allocation5 + $0x80] sm:$0xff]  ;;  %v215_v36 = vld [vmem:[#allocation7 + $0x78] sm:$0xff]  ;;  %v214_v38 = vld [vmem:[#allocation7 + $0x70] sm:$0xff] }
  0x31   :  { %406 = vmatprep.subr.mxu0 %v116_v14  ;;  %v90_v35 = vld [vmem:[#allocation5] sm:$0xff]  ;;  %449 = vmatpush3.msra.mxu1 %v215_v36  ;;  %v213_v39 = vld [vmem:[#allocation7 + $0x68] sm:$0xff]  ;;  %v211_v41 = vld [vmem:[#allocation7 + $0x58] sm:$0xff] }
  0x32   :  { %407 = vmatpush3.msra.mxu0 %v100_v15  ;;  %450 = vmatprep.subr.mxu1 %v593_v37  ;;  %v212_v40 = vld [vmem:[#allocation7 + $0x60] sm:$0xff]  ;;  %v210_v42 = vld [vmem:[#allocation7 + $0x50] sm:$0xff]  ;;  %v209_v43 = vld [vmem:[#allocation7 + $0x48] sm:$0xff] }
  0x33   :  { %408 = vmatprep.subr.mxu0 %v115_v16  ;;  %451 = vmatpush3.msra.mxu1 %v214_v38  ;;  %v208_v44 = vld [vmem:[#allocation7 + $0x40] sm:$0xff]  ;;  %v207_v45 = vld [vmem:[#allocation7 + $0x38] sm:$0xff]  ;;  %v206_v46 = vld [vmem:[#allocation7 + $0x30] sm:$0xff] }
  0x34   :  { %409 = vmatpush3.msra.mxu0 %v99_v17  ;;  %452 = vmatprep.subr.mxu1 %v593_v37  ;;  %v205_v47 = vld [vmem:[#allocation7 + $0x28] sm:$0xff]  ;;  %v204_v56 = vld [vmem:[#allocation7 + $0x20] sm:$0xff]  ;;  %v203_v57 = vld [vmem:[#allocation7 + $0x18] sm:$0xff] }
  0x35   :  { %410 = vmatprep.subr.mxu0 %v114_v18  ;;  %453 = vmatpush3.msra.mxu1 %v213_v39  ;;  %v202_v58 = vld [vmem:[#allocation7 + $0x10] sm:$0xff]  ;;  %v201_v59 = vld [vmem:[#allocation7 + $0x8] sm:$0xff]  ;;  %v200_v60 = vld [vmem:[#allocation7] sm:$0xff] }
  0x36   :  { %411 = vmatpush3.msra.mxu0 %v98_v19  ;;  %454 = vmatprep.subr.mxu1 %v593_v37  ;;  %v293_v61 = vld [vmem:[%s692_s1] sm:$0xff] }
  0x37   :  { %412 = vmatprep.subr.mxu0 %v113_v20  ;;  %455 = vmatpush3.msra.mxu1 %v212_v40  ;;  %v392_v9 = vld [vmem:[%s696_s5] ss:$0 sm:$0xff]  ;;  %vm312_vm4 = vcmp.ge.s32.totalorder %v293_v61, 0 }
  0x38   :  { %413 = vmatpush3.msra.mxu0 %v97_v21  ;;  %456 = vmatprep.subr.mxu1 %v593_v37 }
  0x39   :  { %414 = vmatprep.subr.mxu0 %v112_v22  ;;  %457 = vmatpush3.msra.mxu1 %v211_v41 }
  0x3a   :  { %415 = vmatpush3.msra.mxu0 %v96_v23  ;;  %458 = vmatprep.subr.mxu1 %v593_v37 }
  0x3b   :  { %416 = vmatprep.subr.mxu0 %v111_v24  ;;  %459 = vmatpush3.msra.mxu1 %v210_v42 }
  0x3c   :  { %417 = vmatpush3.msra.mxu0 %v95_v25  ;;  %460 = vmatprep.subr.mxu1 %v593_v37 }
  0x3d   :  { %418 = vmatprep.subr.mxu0 %v110_v26  ;;  %461 = vmatpush3.msra.mxu1 %v209_v43 }
  0x3e   :  { %419 = vmatpush3.msra.mxu0 %v94_v27  ;;  %462 = vmatprep.subr.mxu1 %v593_v37 }
  0x3f   :  { %420 = vmatprep.subr.mxu0 %v109_v28  ;;  %463 = vmatpush3.msra.mxu1 %v208_v44 }
  0x40   :  { %421 = vmatpush3.msra.mxu0 %v93_v29  ;;  %464 = vmatprep.subr.mxu1 %v593_v37 }
  0x41   :  { %422 = vmatprep.subr.mxu0 %v108_v30  ;;  %465 = vmatpush3.msra.mxu1 %v207_v45 }
  0x42   :  { %423 = vmatpush3.msra.mxu0 %v92_v31  ;;  %466 = vmatprep.subr.mxu1 %v593_v37 }
  0x43   :  { %424 = vmatprep.subr.mxu0 %v107_v32  ;;  %467 = vmatpush3.msra.mxu1 %v206_v46 }
  0x44   :  { %425 = vmatpush3.msra.mxu0 %v91_v33  ;;  %468 = vmatprep.subr.mxu1 %v593_v37  ;;  %v394_v33 = vsel %vm312_vm4, 1.0, %v593_v37 }
  0x45   :  { %426 = vmatprep.subr.mxu0 %v106_v34  ;;  %469 = vmatpush3.msra.mxu1 %v205_v47 }
  0x46   :  { %427 = vmatpush3.msra.mxu0 %v90_v35  ;;  %470 = vmatprep.subr.mxu1 %v593_v37 }
  0x47   :  { %471 = vmatpush3.msra.mxu1 %v204_v56  ;;  %295 = vperm.xlu1 %492, %v293_v61  }
  0x48   :  { %472 = vmatprep.subr.mxu1 %v593_v37 }
  0x49   :  { %473 = vmatpush3.msra.mxu1 %v203_v57  ;;  %v356_v57 = vshrl.u32 %v65_v5, 7 }
  0x4a   :  { %474 = vmatprep.subr.mxu1 %v593_v37 }
  0x4b   :  { %475 = vmatpush3.msra.mxu1 %v202_v58  ;;  %vm357_vm7 = vcmp.eq.s32.totalorder %v356_v57, 0 }
  0x4c   :  { %476 = vmatprep.subr.mxu1 %v593_v37  ;;  %vm361_vm10 = vmand %vm357_vm7, %vm360_vm8 }
  0x4d   :  { %477 = vmatpush3.msra.mxu1 %v201_v59  ;;  %vm359_vm11 = vmand %vm357_vm7, %vm358_vm9 }
  0x4e   :  { %478 = vmatprep.subr.mxu1 %v593_v37 }
  0x4f   :  { %479 = vmatpush3.msra.mxu1 %v200_v60 }
  0xb1   :  { %v81_v48 = vpop.xlane.xlu0 %80 }
  0xb2   :  { %v84_v49 = vmax.f32 %v81_v48, 1e-24 }
  0xb4   :  { %494 = vrsqrt.f32 %v84_v49 }
  0xb5   :  { %v76_v50 = vpop.xlane.xlu0 %75 }
  0xb6   :  { %v82_v51 = vmax.f32 %v76_v50, 1e-24 }
  0xb8   :  { %496 = vrsqrt.f32 %v82_v51 }
  0xc1   :  { %v495_v52 = vpop.eup %494 }
  0xc2   :  { %v89_v53 = vmul.f32 %v495_v52, %v641_v0  ;;  %v391_v0 = vld [vmem:[%s694_s3] ss:$0 sm:$0xff]  ;;  %v296_v7 = vpop.permute.xlu1 %295  ;;  %s596_s3 = smov [#allocation8]  }
  0xc3   :  { %vm297_vm1 = vcmp.eq.s32.totalorder %v675_v6, %v296_v7  ;;  %s381_s5 = sshll.u32 %s596_s3, 4  ;;  %s382_s5 = int_to_ptr.vmem [resolvable:$true] %s381_s5 }
  0xc4   :  { %193 = vmatprep.mubr.f32.mxu0 %v89_v53  ;;  %v393_v8 = vsel %vm297_vm1, 1.0, %v593_v37  ;;  %s562_s16 = scalar_lea.vmem %s382_s5, 128  ;;  %p567_p2 = scmp.lt.s32.totalorder %s382_s5, %s382_s5 }
  0xc5   :  { %v497_v54 = vpop.eup %496  ;;  %v301_v11 = vmul.f32 10.5, %v393_v8  ;;  %p563_p1 = scmp.ne.s32.totalorder %s382_s5, %s562_s16  ;;  %p568_p3 = scmp.lt.s32.totalorder %s562_s16, %s562_s16 }
  0xc6   :  { %v88_v55 = vmul.f32 %v497_v54, %v643_v1 }
  0xc7   :  { %p569_p4 = por %p568_p3, %p567_p2 }
  0xc8   :  { %194 = vmatmul.mubr.f32.vlgmr.msra.gmra.mxu0 %v88_v55 }
  0xc9   :  { %p570_p5 = pnand %p569_p4, %p563_p1 }
 0x188   :  { %v428_v63 = vpop.f32.mrf.mxu0 }
 0x18a   :  { %v429_v1 = vpop.f32.mrf.mxu0 }
 0x18b   :  { %v430_v2 = vadd.f32 %v429_v1, %v428_v63 }
 0x18d   :  { %v196_v3 = vadd.f32 %v430_v2, %v391_v0 }
 0x18f   :  { %v199_v4 = vmax.f32 %v196_v3, 0.0 }
 0x191   :  { %481 = vmatmul.mubr.f32.vlgmr.msra.gmra.mxu1 %v199_v4 }
 0x251   :  { %v289_v10 = vpop.f32.mrf.mxu1 }
 0x252   :  { %v290_v12 = vadd.f32 %v392_v9, %v289_v10 }
 0x253   :  { %v482_v13 = vpop.f32.mrf.mxu1 }
 0x254   :  { %v300_v14 = vmul.f32 30.0, %v290_v12 }
 0x256   :  { %v302_v15 = vsub.f32 %v300_v14, %v301_v11 }
 0x258   :  { %303 = vmax.xlane.f32.xlu1 %v302_v15 }
 0x2e1   :  { %v304_v16 = vpop.xlane.xlu1 %303 }
 0x2e2   :  { %v305_v17 = vsub.f32 %v302_v15, %v304_v16  ;;  %vm329_vm2 = vcmp.eq.f32.partialorder %v302_v15, %v304_v16 }
 0x2e3   :  { %v330_v18 = vsel %vm329_vm2, %v675_v6, 128 }
 0x2e4   :  { %v306_v19 = vmul.f32 1.442695, %v305_v17  ;;  %v332_v20 = vshra.s32 %v330_v18, 16  ;;  %v331_v23 = vand.u32 65535, %v330_v18  ;;  %v315_v27 = vmul.f32 %v393_v8, %v305_v17 }
 0x2e6   :  { %498 = vpow2.f32 %v306_v19  ;;  %v334_v21 = vcvt.s32.f32 %v332_v20  ;;  %v333_v25 = vcvt.s32.f32 %v331_v23 }
 0x2e8   :  { %335 = vmin.xlane.f32.xlu0 %v334_v21 }
 0x2f3   :  { %v499_v22 = vpop.eup %498 }
 0x2f4   :  { %308 = vadd.xlane.f32.xlu0 %v499_v22 }
 0x371   :  { %v336_v24 = vpop.xlane.xlu0 %335 }
 0x372   :  { %vm337_vm3 = vcmp.eq.f32.partialorder %v334_v21, %v336_v24  ;;  %v342_v30 = vcvt.f32.s32 %v336_v24 }
 0x373   :  { %v338_v26 = vsel %vm337_vm3, %v333_v25, inf }
 0x374   :  { %339 = vmin.xlane.f32.xlu0 %v338_v26  ;;  %v343_v34 = vshll.u32 %v342_v30, 16 }
 0x378   :  { %316 = vadd.xlane.f32.xlu0 %v315_v27 }
 0x37d   :  { %v309_v28 = vpop.xlane.xlu0 %308 }
 0x37e   :  { %500 = vlog2.f32 %v309_v28 }
 0x38b   :  { %v501_v29 = vpop.eup %500 }
 0x38c   :  { %v311_v31 = vmul.f32 0.6931472, %v501_v29 }
 0x38e   :  { %v318_v38 = vmul.f32 %v394_v33, %v311_v31 }
 0x3fd   :  { %v340_v32 = vpop.xlane.xlu0 %339 }
 0x3fe   :  { %v341_v35 = vcvt.f32.s32 %v340_v32 }
 0x400   :  { %v344_v36 = vadd.s32 %v343_v34, %v341_v35 }
 0x401   :  { %v317_v39 = vpop.xlane.xlu0 %316 }
 0x402   :  { %vm345_vm6 = vcmp.eq.s32.totalorder %v344_v36, %v293_v61  ;;  %v319_v40 = vsub.f32 %v317_v39, %v318_v38 }
 0x403   :  { %v395_v41 = vsel %vm345_vm6, 1.0, %v593_v37 }
 0x404   :  { %v348_v42 = vsel %vm320_vm5, %v395_v41, 0.0  ;;  %v321_v43 = vsel %vm320_vm5, %v319_v40, 0.0 }
 0x405   :  { %v349_v44 = vrot.slane %v348_v42, 4  ;;  %v322_v45 = vrot.slane %v321_v43, 4 }
 0x407   :  { %v350_v46 = vadd.f32 %v349_v44, %v348_v42  ;;  %v323_v47 = vadd.f32 %v322_v45, %v321_v43 }
 0x409   :  { %v351_v48 = vrot.slane %v350_v46, 2  ;;  %v324_v49 = vrot.slane %v323_v47, 2 }
 0x40b   :  { %v325_v50 = vadd.f32 %v324_v49, %v323_v47  ;;  %v352_v51 = vadd.f32 %v351_v48, %v350_v46 }
 0x40d   :  { %v353_v52 = vrot.slane %v352_v51, 1  ;;  %v326_v53 = vrot.slane %v325_v50, 1 }
 0x40f   :  { %v354_v54 = vadd.f32 %v353_v52, %v352_v51  ;;  %v327_v55 = vadd.f32 %v326_v53, %v325_v50 }
 0x411   :  { %364 = vperm.xlu0 %493, %v354_v54   ;;  %v328_v56 = vsub.f32 0.0, %v327_v55 }
 0x413   :  { %370 = vperm.xlu1 %492, %v328_v56  }
 0x48c   :  { %v365_v37 = vpop.permute.xlu0 %364 }
 0x48d   :  { %v367_v58 = vsel %vm361_vm10, %v365_v37, 0.0 }
 0x48e   :  { %v371_v59 = vpop.permute.xlu1 %370 }
 0x48f   :  { %v373_v60 = vsel %vm359_vm11, %v371_v59, %v367_v58 }
 0x490   :  { %374 = vst [vmem:[#allocation8] sm:$0xff] %v373_v60 }
 0x491   :  { %573 = shalt.err (!%p570_p5)
}
 0x492   :  { %384 = dma.vmem_to_hbm [thread:$0]  %s382_s5, 128, %s697_s6, [#allocation4]  }
 0x493   :  { %586 = dma.done.wait [#allocation4], 128  }
 0x494   :  { %587 = vsyncadd [#allocation4], 4294967168 }
 0x495   :  { %388 = vsyncpa [#allocation3], 1 }
 0x496   :  { %389 = vsyncpa [#allocation6], 1 }
 0x497   :  { %390 = vsyncpa [#allocation4], 1 }

</bundles_post_ra>
